<compile_context>
chip_gen: v7x
topology: tpu7x:2x2x1
jax: 0.10.0
libtpu: 0.0.40
codegen_flags: <defaults>
</compile_context>

<pallas_src>
import math
import jax
import jax.numpy as jnp
from jax.experimental import pallas as pl
from jax.experimental.pallas import tpu as pltpu


def _mlp_kernel_t(xt_ref, w1t_ref, b1_ref, w2t_ref, b2_ref, ot_ref):
    """Transposed fused MLP: out^T = tanh(W2^T @ relu(W1^T @ x^T + b1) + b2)."""
    xt = xt_ref[...]                                      # (S, TB)  compute dtype
    # Layer 1: (H, S) @ (S, TB) -> (H, TB), f32 accumulation on the MXU.
    h = jnp.dot(w1t_ref[...], xt, preferred_element_type=jnp.float32)
    h = h + b1_ref[...]                                   # (H, TB) + (H, 1) lane-broadcast
    h = jnp.maximum(h, 0.0)                               # ReLU (VPU, f32)
    # Layer 2: (A, H) @ (H, TB) -> (A, TB), f32 accumulation on the MXU.
    y = jnp.dot(w2t_ref[...], h.astype(w2t_ref.dtype),
                preferred_element_type=jnp.float32)
    y = y + b2_ref[...]                                   # (A, TB) + (A, 1)
    ot_ref[...] = jnp.tanh(y).astype(ot_ref.dtype)        # Tanh (EUP), lane-dense store


def drl_model_forward(state, w1, b1, w2, b2, *, tb=256, compute_dtype=jnp.bfloat16):
    """Fused forward pass of DRLModel.

    state: (B, state_dim) float32
    w1: (state_dim, hidden), b1: (hidden,)
    w2: (hidden, action_dim), b2: (action_dim,)
    returns: (B, action_dim) float32
    """
    B, S = state.shape
    H = w1.shape[1]
    A = w2.shape[1]

    b_pad = pl.cdiv(B, tb) * tb
    num_blocks = b_pad // tb

    # Lane-dense layout: batch on the last (lane) dim; one-time wrapper transposes.
    xt = jnp.pad(state, ((0, b_pad - B), (0, 0))).T.astype(compute_dtype)   # (S, b_pad)
    w1t = w1.T.astype(compute_dtype)                                        # (H, S)
    w2t = w2.T.astype(compute_dtype)                                        # (A, H)
    b1c = b1.reshape(H, 1).astype(jnp.float32)                              # (H, 1)
    b2c = b2.reshape(A, 1).astype(jnp.float32)                              # (A, 1)

    out_t = pl.pallas_call(
        _mlp_kernel_t,
        out_shape=jax.ShapeDtypeStruct((A, b_pad), jnp.float32),
        grid=(num_blocks,),
        in_specs=[
            pl.BlockSpec((S, tb), lambda i: (0, i)),   # x^T : streamed batch tiles
            pl.BlockSpec((H, S), lambda i: (0, 0)),    # W1^T: resident across the grid
            pl.BlockSpec((H, 1), lambda i: (0, 0)),    # b1  : resident
            pl.BlockSpec((A, H), lambda i: (0, 0)),    # W2^T: resident
            pl.BlockSpec((A, 1), lambda i: (0, 0)),    # b2  : resident
        ],
        out_specs=pl.BlockSpec((A, tb), lambda i: (0, i)),
        compiler_params=pltpu.CompilerParams(
            dimension_semantics=("parallel",),         # independent batch tiles
        ),
    )(xt, w1t, b1c, w2t, b2c)

    return out_t[:, :B].T                              # (B, A) float32


def init_params(key, state_dim, action_dim, hidden_dim=128):
    """Deterministic init mimicking nn.Linear default (uniform +/- 1/sqrt(fan_in))."""
    k1, k2, k3, k4 = jax.random.split(key, 4)
    bound1 = 1.0 / math.sqrt(state_dim)
    bound2 = 1.0 / math.sqrt(hidden_dim)
    w1 = jax.random.uniform(k1, (state_dim, hidden_dim), jnp.float32, -bound1, bound1)
    b1 = jax.random.uniform(k2, (hidden_dim,), jnp.float32, -bound1, bound1)
    w2 = jax.random.uniform(k3, (hidden_dim, action_dim), jnp.float32, -bound2, bound2)
    b2 = jax.random.uniform(k4, (action_dim,), jnp.float32, -bound2, bound2)
    return w1, b1, w2, b2


def _reference(state, w1, b1, w2, b2):
    return jnp.tanh(jnp.maximum(state @ w1 + b1, 0.0) @ w2 + b2)


if __name__ == "__main__":
    key = jax.random.PRNGKey(0)
    k_state, k_big, k_params = jax.random.split(key, 3)

    state_dim, action_dim, hidden_dim = 8, 4, 128
    w1, b1, w2, b2 = init_params(k_params, state_dim, action_dim, hidden_dim)

    # --- Small case (B=2), f32 compute path: tight semantic check vs PyTorch math.
    B_small = 2
    state_small = jax.random.normal(k_state, (B_small, state_dim), jnp.float32)
    out_small = drl_model_forward(state_small, w1, b1, w2, b2,
                                  compute_dtype=jnp.float32)
    out_small = jax.block_until_ready(out_small)
    ref_small = _reference(state_small, w1, b1, w2, b2)
    assert out_small.shape == (B_small, action_dim)
    assert jnp.allclose(out_small, ref_small, atol=1e-4, rtol=1e-4), "f32 path mismatch"

    # --- Batched case (B=384, not a multiple of TB=256): exercises the multi-step
    #     parallel grid, padding/slicing, and the bf16-stream fast path.
    B_big = 384
    state_big = jax.random.normal(k_big, (B_big, state_dim), jnp.float32)
    out_big = drl_model_forward(state_big, w1, b1, w2, b2,
                                tb=256, compute_dtype=jnp.bfloat16)
    out_big = jax.block_until_ready(out_big)
    ref_big = _reference(state_big, w1, b1, w2, b2)
    assert out_big.shape == (B_big, action_dim)
    assert jnp.allclose(out_big, ref_big, atol=5e-2, rtol=0.0), "bf16 path mismatch"

    print("KERNEL_OK")
</pallas_src>

<mosaic_0001>
module attributes {stable_mosaic.version = 11 : i64} {
  func.func @_mlp_kernel_t(%arg0: i32, %arg1: memref<8x256xf32, #tpu.memory_space<vmem>>, %arg2: memref<128x8xf32, #tpu.memory_space<vmem>>, %arg3: memref<128x1xf32, #tpu.memory_space<vmem>>, %arg4: memref<4x128xf32, #tpu.memory_space<vmem>>, %arg5: memref<4x1xf32, #tpu.memory_space<vmem>>, %arg6: memref<4x256xf32, #tpu.memory_space<vmem>>) attributes {dimension_semantics = [#tpu.dimension_semantics<parallel>], iteration_bounds = array<i64: 1>, scalar_prefetch = 0 : i64, scratch_operands = 0 : i64, tpu.core_type = #tpu.core_type<tc>, window_params = [{transform_indices = @transform_0, window_bounds = array<i64: 8, 256>}, {pipeline_mode = #tpu.pipeline_mode<synchronous>, transform_indices = @transform_1, window_bounds = array<i64: 128, 8>}, {pipeline_mode = #tpu.pipeline_mode<synchronous>, transform_indices = @transform_2, window_bounds = array<i64: 128, 1>}, {pipeline_mode = #tpu.pipeline_mode<synchronous>, transform_indices = @transform_3, window_bounds = array<i64: 4, 128>}, {pipeline_mode = #tpu.pipeline_mode<synchronous>, transform_indices = @transform_4, window_bounds = array<i64: 4, 1>}, {transform_indices = @transform_5, window_bounds = array<i64: 4, 256>}]} {
    %c0 = arith.constant 0 : index
    %c0_0 = arith.constant 0 : index
    %0 = vector.load %arg1[%c0, %c0_0] : memref<8x256xf32, #tpu.memory_space<vmem>>, vector<8x256xf32>
    %c0_1 = arith.constant 0 : index
    %c0_2 = arith.constant 0 : index
    %1 = vector.load %arg2[%c0_1, %c0_2] : memref<128x8xf32, #tpu.memory_space<vmem>>, vector<128x8xf32>
    %cst = arith.constant dense<0.000000e+00> : vector<128x256xf32>
    %2 = tpu.matmul %1, %0, %cst {dimension_numbers = #tpu.dot_dimension_numbers<[1], [0], [0], [1], [0, 0, 1, 1], [], []>} : vector<128x8xf32>, vector<8x256xf32>, vector<128x256xf32> -> vector<128x256xf32>
    %c0_3 = arith.constant 0 : index
    %c0_4 = arith.constant 0 : index
    %3 = vector.load %arg3[%c0_3, %c0_4] : memref<128x1xf32, #tpu.memory_space<vmem>>, vector<128x1xf32>
    %4 = vector.broadcast %3 : vector<128x1xf32> to vector<128x256xf32>
    %5 = arith.addf %2, %4 : vector<128x256xf32>
    %cst_5 = arith.constant 0.000000e+00 : f32
    %6 = vector.broadcast %cst_5 : f32 to vector<128x256xf32>
    %7 = arith.maximumf %5, %6 : vector<128x256xf32>
    %c0_6 = arith.constant 0 : index
    %c0_7 = arith.constant 0 : index
    %8 = vector.load %arg4[%c0_6, %c0_7] : memref<4x128xf32, #tpu.memory_space<vmem>>, vector<4x128xf32>
    %cst_8 = arith.constant dense<0.000000e+00> : vector<4x256xf32>
    %9 = tpu.matmul %8, %7, %cst_8 {dimension_numbers = #tpu.dot_dimension_numbers<[1], [0], [0], [1], [0, 0, 1, 1], [], []>} : vector<4x128xf32>, vector<128x256xf32>, vector<4x256xf32> -> vector<4x256xf32>
    %c0_9 = arith.constant 0 : index
    %c0_10 = arith.constant 0 : index
    %10 = vector.load %arg5[%c0_9, %c0_10] : memref<4x1xf32, #tpu.memory_space<vmem>>, vector<4x1xf32>
    %11 = vector.broadcast %10 : vector<4x1xf32> to vector<4x256xf32>
    %12 = arith.addf %9, %11 : vector<4x256xf32>
    %13 = math.tanh %12 : vector<4x256xf32>
    %c0_11 = arith.constant 0 : index
    %c0_12 = arith.constant 0 : index
    %14 = vector.load %arg6[%c0_11, %c0_12] : memref<4x256xf32, #tpu.memory_space<vmem>>, vector<4x256xf32>
    tpu.vector_store %arg6[%c0_11, %c0_12], %13 {strides = array<i32>} : memref<4x256xf32, #tpu.memory_space<vmem>>, vector<4x256xf32>,
    return
  }
  func.func @transform_0(%arg0: i32) -> (i32, i32) {
    %c0_i32 = arith.constant 0 : i32
    %c0_i32_0 = arith.constant 0 : i32
    return %c0_i32, %arg0 : i32, i32
  }
  func.func @transform_1(%arg0: i32) -> (i32, i32) {
    %c0_i32 = arith.constant 0 : i32
    %c0_i32_0 = arith.constant 0 : i32
    %c0_i32_1 = arith.constant 0 : i32
    return %c0_i32, %c0_i32_0 : i32, i32
  }
  func.func @transform_2(%arg0: i32) -> (i32, i32) {
    %c0_i32 = arith.constant 0 : i32
    %c0_i32_0 = arith.constant 0 : i32
    %c0_i32_1 = arith.constant 0 : i32
    return %c0_i32, %c0_i32_0 : i32, i32
  }
  func.func @transform_3(%arg0: i32) -> (i32, i32) {
    %c0_i32 = arith.constant 0 : i32
    %c0_i32_0 = arith.constant 0 : i32
    %c0_i32_1 = arith.constant 0 : i32
    return %c0_i32, %c0_i32_0 : i32, i32
  }
  func.func @transform_4(%arg0: i32) -> (i32, i32) {
    %c0_i32 = arith.constant 0 : i32
    %c0_i32_0 = arith.constant 0 : i32
    %c0_i32_1 = arith.constant 0 : i32
    return %c0_i32, %c0_i32_0 : i32, i32
  }
  func.func @transform_5(%arg0: i32) -> (i32, i32) {
    %c0_i32 = arith.constant 0 : i32
    %c0_i32_0 = arith.constant 0 : i32
    return %c0_i32, %arg0 : i32, i32
  }
}

</mosaic_0001>

<bundles_post_ra>
// kernel: tpu_custom_call.1
= control target key start
LH: loop header
LB: loop body
LE: loop exit
PB: predicated region body
PF: predicated region fallthrough
CT: control target
= control target key end

     0   :  { %vm135_vm0 = vcmask 64512   ;;  %v557_v3 = vmov 0.0   ;;  %v558_v4 = vmov 0   ;;  %s743_s0 = inlined_call_operand.vmem [shape: f32[8,256], index: 0, kind: input, shape index: {}]   ;;  %s744_s1 = inlined_call_operand.vmem [shape: f32[128,8], index: 1, kind: input, shape index: {}]   ;;  %s745_s2 = inlined_call_operand.vmem [shape: f32[128,1], index: 2, kind: input, shape index: {}]   ;;  %s746_s3 = inlined_call_operand.vmem [shape: f32[4,128], index: 3, kind: input, shape index: {}]   ;;  %s747_s4 = inlined_call_operand.vmem [shape: f32[4,1], index: 4, kind: input, shape index: {}]   ;;  %s748_s5 = inlined_call_operand.hbm [shape: f32[4,256], index: 5, kind: output, shape index: {}]  }
   0x1   :  { %v22_v0 = vld [vmem:[%s743_s0 + $0x8] sm:$0xff]  ;;  %v21_v1 = vld [vmem:[%s743_s0] sm:$0xff]  ;;  %248 = vmatprep.mubr.f32.mxu0 %v557_v3  ;;  %527 = vset.pattern.permute.xlu0 %v558_v4  ;;  %v41_v7 = vld [vmem:[%s745_s2 + $0x10] sm:$0xff] }
   0x2   :  { %v23_v2 = vld [vmem:[%s744_s1] sm:$0xff]  ;;  %184 = vmatprep.subr.mxu0 %v22_v0  ;;  %528 = vset.pattern.permute.xlu1 %v558_v4  ;;  %v24_v5 = vld [vmem:[%s744_s1 + $0x8] sm:$0xff]  ;;  %v25_v8 = vld [vmem:[%s744_s1 + $0x10] sm:$0xff] }
   0x3   :  { %185 = vmatpush1.msra.mxu0 %v21_v1  ;;  %448 = vmatprep.mubr.f32.mxu1 %v557_v3  ;;  %v39_v6 = vld [vmem:[%s745_s2] sm:$0xff]  ;;  %v40_v9 = vld [vmem:[%s745_s2 + $0x8] sm:$0xff]  ;;  %v42_v10 = vld [vmem:[%s745_s2 + $0x18] sm:$0xff] }
   0x4   :  { %476 = vmatmul.mubr.msk.f32.vlgmr.msra.gmra.mrb[0].mxu0 %vm135_vm0, %v23_v2  ;;  %57 = vperm.xlu0 %527, %v39_v6  }
   0x5   :  { %254 = vmatprep.mubr.f32.mxu0 %v557_v3  ;;  %67 = vperm.xlu1 %528, %v41_v7  }
   0x8   :  { %477 = vmatmul.mubr.msk.f32.gmra.mrb[2].mxu0 %vm135_vm0, %v24_v5  ;;  %62 = vperm.xlu0 %527, %v40_v9  }
   0x9   :  { %260 = vmatprep.mubr.f32.mxu0 %v557_v3 }
   0xc   :  { %478 = vmatmul.mubr.msk.f32.gmra.mrb[4].mxu0 %vm135_vm0, %v25_v8 }
   0xd   :  { %10 = vsyncpa [#allocation3], 0  ;;  %266 = vmatprep.mubr.f32.mxu0 %v557_v3  ;;  %v26_v11 = vld [vmem:[%s744_s1 + $0x18] sm:$0xff]  ;;  %v43_v12 = vld [vmem:[%s745_s2 + $0x20] sm:$0xff]  ;;  %72 = vperm.xlu1 %528, %v42_v10   ;;  %s559_s9 = smov [#allocation2]  }
   0xe   :  { %v44_v13 = vld [vmem:[%s745_s2 + $0x28] sm:$0xff]  ;;  %77 = vperm.xlu0 %527, %v43_v12   ;;  %v27_v14 = vld [vmem:[%s744_s1 + $0x20] sm:$0xff]  ;;  %v45_v15 = vld [vmem:[%s745_s2 + $0x30] sm:$0xff]  ;;  %s468_s10 = sshll.u32 %s559_s9, 4  ;;  %s469_s10 = int_to_ptr.vmem [resolvable:$true] %s468_s10 }
   0xf   :  { %v46_v16 = vld [vmem:[%s745_s2 + $0x38] sm:$0xff]  ;;  %v28_v17 = vld [vmem:[%s744_s1 + $0x28] sm:$0xff]  ;;  %v47_v18 = vld [vmem:[%s745_s2 + $0x40] sm:$0xff]  ;;  %s533_s11 = scalar_lea.vmem %s469_s10, 128  ;;  %p538_p1 = scmp.lt.s32.totalorder %s469_s10, %s469_s10 }
  0x10   :  { %479 = vmatmul.mubr.msk.f32.gmra.mrb[6].mxu0 %vm135_vm0, %v26_v11  ;;  %v48_v19 = vld [vmem:[%s745_s2 + $0x48] sm:$0xff]  ;;  %v29_v20 = vld [vmem:[%s744_s1 + $0x30] sm:$0xff]  ;;  %v50_v22 = vld [vmem:[%s745_s2 + $0x58] sm:$0xff]  ;;  %p534_p0 = scmp.ne.s32.totalorder %s469_s10, %s533_s11  ;;  %p539_p2 = scmp.lt.s32.totalorder %s533_s11, %s533_s11 }
  0x11   :  { %272 = vmatprep.mubr.f32.mxu0 %v557_v3  ;;  %82 = vperm.xlu1 %528, %v44_v13   ;;  %v49_v21 = vld [vmem:[%s745_s2 + $0x50] sm:$0xff]  ;;  %v30_v23 = vld [vmem:[%s744_s1 + $0x38] sm:$0xff]  ;;  %v51_v24 = vld [vmem:[%s745_s2 + $0x60] sm:$0xff] }
  0x12   :  { %87 = vperm.xlu0 %527, %v45_v15   ;;  %v52_v25 = vld [vmem:[%s745_s2 + $0x68] sm:$0xff]  ;;  %v31_v26 = vld [vmem:[%s744_s1 + $0x40] sm:$0xff]  ;;  %v53_v27 = vld [vmem:[%s745_s2 + $0x70] sm:$0xff]  ;;  %p540_p3 = por %p539_p2, %p538_p1 }
  0x13   :  { %v54_v28 = vld [vmem:[%s745_s2 + $0x78] sm:$0xff]  ;;  %v32_v29 = vld [vmem:[%s744_s1 + $0x48] sm:$0xff]  ;;  %v378_v30 = vld [vmem:[%s747_s4] sm:$0xf] }
  0x14   :  { %480 = vmatmul.mubr.msk.f32.gmra.mrb[8].mxu0 %vm135_vm0, %v27_v14  ;;  %v33_v31 = vld [vmem:[%s744_s1 + $0x50] sm:$0xff]  ;;  %v34_v32 = vld [vmem:[%s744_s1 + $0x58] sm:$0xff]  ;;  %v35_v33 = vld [vmem:[%s744_s1 + $0x60] sm:$0xff]  ;;  %p541_p4 = pnand %p540_p3, %p534_p0 }
  0x15   :  { %278 = vmatprep.mubr.f32.mxu0 %v557_v3  ;;  %92 = vperm.xlu1 %528, %v46_v16   ;;  %v36_v34 = vld [vmem:[%s744_s1 + $0x68] sm:$0xff]  ;;  %v37_v35 = vld [vmem:[%s744_s1 + $0x70] sm:$0xff]  ;;  %v38_v36 = vld [vmem:[%s744_s1 + $0x78] sm:$0xff] }
  0x16   :  { %97 = vperm.xlu0 %527, %v47_v18  }
  0x18   :  { %481 = vmatmul.mubr.msk.f32.gmra.mrb[10].mxu0 %vm135_vm0, %v28_v17 }
  0x19   :  { %284 = vmatprep.mubr.f32.mxu0 %v557_v3  ;;  %102 = vperm.xlu1 %528, %v48_v19  }
  0x1a   :  { %107 = vperm.xlu0 %527, %v49_v21  }
  0x1c   :  { %482 = vmatmul.mubr.msk.f32.gmra.mrb[12].mxu0 %vm135_vm0, %v29_v20 }
  0x1d   :  { %290 = vmatprep.mubr.f32.mxu0 %v557_v3  ;;  %112 = vperm.xlu1 %528, %v50_v22  }
  0x1e   :  { %117 = vperm.xlu0 %527, %v51_v24  }
  0x20   :  { %483 = vmatmul.mubr.msk.f32.gmra.mrb[14].mxu0 %vm135_vm0, %v30_v23 }
  0x21   :  { %296 = vmatprep.mubr.f32.mxu0 %v557_v3  ;;  %122 = vperm.xlu1 %528, %v52_v25  }
  0x22   :  { %127 = vperm.xlu0 %527, %v53_v27  }
  0x24   :  { %484 = vmatmul.mubr.msk.f32.gmra.mrb[16].mxu0 %vm135_vm0, %v31_v26 }
  0x25   :  { %302 = vmatprep.mubr.f32.mxu0 %v557_v3  ;;  %132 = vperm.xlu1 %528, %v54_v28  }
  0x26   :  { %381 = vperm.xlu0 %527, %v378_v30  }
  0x28   :  { %485 = vmatmul.mubr.msk.f32.gmra.mrb[18].mxu0 %vm135_vm0, %v32_v29 }
  0x29   :  { %308 = vmatprep.mubr.f32.mxu0 %v557_v3 }
  0x2c   :  { %486 = vmatmul.mubr.msk.f32.gmra.mrb[20].mxu0 %vm135_vm0, %v33_v31 }
  0x2d   :  { %314 = vmatprep.mubr.f32.mxu0 %v557_v3 }
  0x30   :  { %487 = vmatmul.mubr.msk.f32.gmra.mrb[22].mxu0 %vm135_vm0, %v34_v32 }
  0x31   :  { %320 = vmatprep.mubr.f32.mxu0 %v557_v3 }
  0x34   :  { %488 = vmatmul.mubr.msk.f32.gmra.mrb[24].mxu0 %vm135_vm0, %v35_v33 }
  0x35   :  { %326 = vmatprep.mubr.f32.mxu0 %v557_v3 }
  0x38   :  { %489 = vmatmul.mubr.msk.f32.gmra.mrb[26].mxu0 %vm135_vm0, %v36_v34 }
  0x39   :  { %332 = vmatprep.mubr.f32.mxu0 %v557_v3 }
  0x3c   :  { %490 = vmatmul.mubr.msk.f32.gmra.mrb[28].mxu0 %vm135_vm0, %v37_v35 }
  0x3d   :  { %338 = vmatprep.mubr.f32.mxu0 %v557_v3 }
  0x40   :  { %491 = vmatmul.mubr.msk.f32.gmra.mrb[30].mxu0 %vm135_vm0, %v38_v36 }
  0x83   :  { %v58_v37 = vpop.permute.xlu0 %57 }
  0x84   :  { %v68_v46 = vpop.permute.xlu1 %67 }
  0x87   :  { %v63_v41 = vpop.permute.xlu0 %62 }
  0x8c   :  { %v73_v57 = vpop.permute.xlu1 %72 }
  0x8d   :  { %v78_v6 = vpop.permute.xlu0 %77 }
  0x90   :  { %v83_v9 = vpop.permute.xlu1 %82 }
  0x91   :  { %v88_v22 = vpop.permute.xlu0 %87 }
  0x94   :  { %v93_v25 = vpop.permute.xlu1 %92 }
  0xd7   :  { %v250_v38 = vpop.f32.mrb[0].mxu0 }
  0xd8   :  { %v252_v39 = vpop.f32.mrb[1].mxu0  ;;  %v251_v40 = vadd.f32 %v250_v38, %v58_v37  ;;  %v98_v38 = vpop.permute.xlu0 %97 }
  0xd9   :  { %v253_v42 = vadd.f32 %v252_v39, %v58_v37 }
  0xda   :  { %v345_v48 = vmax.f32 %v251_v40, 0.0 }
  0xdb   :  { %v256_v43 = vpop.f32.mrb[2].mxu0  ;;  %v346_v50 = vmax.f32 %v253_v42, 0.0 }
  0xdc   :  { %v257_v44 = vadd.f32 %v256_v43, %v63_v41  ;;  %v258_v45 = vpop.f32.mrb[3].mxu0 }
  0xdd   :  { %v259_v47 = vadd.f32 %v258_v45, %v63_v41  ;;  %v103_v41 = vpop.permute.xlu1 %102 }
  0xde   :  { %v347_v49 = vmax.f32 %v257_v44, 0.0 }
  0xdf   :  { %v348_v51 = vmax.f32 %v259_v47, 0.0  ;;  %v262_v52 = vpop.f32.mrb[4].mxu0 }
  0xe0   :  { %v264_v53 = vpop.f32.mrb[5].mxu0  ;;  %v494_v54 = vpack.c.bf16 %v347_v49, %v345_v48  ;;  %v263_v56 = vadd.f32 %v262_v52, %v68_v46 }
  0xe1   :  { %v492_v55 = vpack.c.bf16 %v348_v51, %v346_v50  ;;  %v265_v58 = vadd.f32 %v264_v53, %v68_v46 }
  0xe2   :  { %v349_v63 = vmax.f32 %v263_v56, 0.0 }
  0xe3   :  { %v268_v59 = vpop.f32.mrb[6].mxu0  ;;  %493 = vmatprep.subr.bf16.mxu1 %v492_v55  ;;  %v350_v1 = vmax.f32 %v265_v58, 0.0 }
  0xe4   :  { %v269_v60 = vadd.f32 %v268_v59, %v73_v57  ;;  %v270_v61 = vpop.f32.mrb[7].mxu0  ;;  %495 = vmatpush1.bf16.msra.mxu1 %v494_v54  ;;  %v108_v54 = vpop.permute.xlu0 %107 }
  0xe5   :  { %v271_v62 = vadd.f32 %v270_v61, %v73_v57  ;;  %v113_v57 = vpop.permute.xlu1 %112 }
  0xe6   :  { %v351_v0 = vmax.f32 %v269_v60, 0.0 }
  0xe7   :  { %v352_v2 = vmax.f32 %v271_v62, 0.0  ;;  %v274_v3 = vpop.f32.mrb[8].mxu0 }
  0xe8   :  { %v498_v4 = vpack.c.bf16 %v351_v0, %v349_v63  ;;  %v276_v5 = vpop.f32.mrb[9].mxu0  ;;  %v275_v8 = vadd.f32 %v274_v3, %v78_v6 }
  0xe9   :  { %v496_v7 = vpack.c.bf16 %v352_v2, %v350_v1  ;;  %v277_v10 = vadd.f32 %v276_v5, %v78_v6  ;;  %v118_v6 = vpop.permute.xlu0 %117 }
  0xea   :  { %v353_v15 = vmax.f32 %v275_v8, 0.0 }
  0xeb   :  { %v280_v11 = vpop.f32.mrb[10].mxu0  ;;  %497 = vmatprep.subr.bf16.mxu1 %v496_v7  ;;  %v354_v17 = vmax.f32 %v277_v10, 0.0 }
  0xec   :  { %v281_v12 = vadd.f32 %v280_v11, %v83_v9  ;;  %v282_v13 = vpop.f32.mrb[11].mxu0  ;;  %499 = vmatpush1.bf16.msra.mxu1 %v498_v4 }
  0xed   :  { %v283_v14 = vadd.f32 %v282_v13, %v83_v9  ;;  %v123_v9 = vpop.permute.xlu1 %122 }
  0xee   :  { %v355_v16 = vmax.f32 %v281_v12, 0.0 }
  0xef   :  { %v356_v18 = vmax.f32 %v283_v14, 0.0  ;;  %v286_v19 = vpop.f32.mrb[12].mxu0 }
  0xf0   :  { %v502_v20 = vpack.c.bf16 %v355_v16, %v353_v15  ;;  %v288_v21 = vpop.f32.mrb[13].mxu0  ;;  %v287_v24 = vadd.f32 %v286_v19, %v88_v22 }
  0xf1   :  { %v500_v23 = vpack.c.bf16 %v356_v18, %v354_v17  ;;  %v289_v26 = vadd.f32 %v288_v21, %v88_v22  ;;  %v128_v22 = vpop.permute.xlu0 %127 }
  0xf2   :  { %v357_v31 = vmax.f32 %v287_v24, 0.0 }
  0xf3   :  { %v292_v27 = vpop.f32.mrb[14].mxu0  ;;  %501 = vmatprep.subr.bf16.mxu1 %v500_v23  ;;  %v358_v33 = vmax.f32 %v289_v26, 0.0 }
  0xf4   :  { %v293_v28 = vadd.f32 %v292_v27, %v93_v25  ;;  %v294_v29 = vpop.f32.mrb[15].mxu0  ;;  %503 = vmatpush1.bf16.msra.mxu1 %v502_v20 }
  0xf5   :  { %v295_v30 = vadd.f32 %v294_v29, %v93_v25  ;;  %v133_v25 = vpop.permute.xlu1 %132 }
  0xf6   :  { %v359_v32 = vmax.f32 %v293_v28, 0.0 }
  0xf7   :  { %v360_v34 = vmax.f32 %v295_v30, 0.0  ;;  %v298_v35 = vpop.f32.mrb[16].mxu0 }
  0xf8   :  { %v506_v36 = vpack.c.bf16 %v359_v32, %v357_v31  ;;  %v300_v37 = vpop.f32.mrb[17].mxu0  ;;  %v299_v40 = vadd.f32 %v298_v35, %v98_v38 }
  0xf9   :  { %v504_v39 = vpack.c.bf16 %v360_v34, %v358_v33  ;;  %v301_v42 = vadd.f32 %v300_v37, %v98_v38  ;;  %v377_v37 = vld [vmem:[%s746_s3] sm:$0xf]  ;;  %v382_v38 = vpop.permute.xlu0 %381 }
  0xfa   :  { %v361_v47 = vmax.f32 %v299_v40, 0.0 }
  0xfb   :  { %v304_v43 = vpop.f32.mrb[18].mxu0  ;;  %505 = vmatprep.subr.bf16.mxu1 %v504_v39  ;;  %v362_v49 = vmax.f32 %v301_v42, 0.0 }
  0xfc   :  { %v305_v44 = vadd.f32 %v304_v43, %v103_v41  ;;  %v306_v45 = vpop.f32.mrb[19].mxu0  ;;  %507 = vmatpush1.bf16.msra.mxu1 %v506_v36 }
  0xfd   :  { %v307_v46 = vadd.f32 %v306_v45, %v103_v41 }
  0xfe   :  { %v363_v48 = vmax.f32 %v305_v44, 0.0 }
  0xff   :  { %v364_v50 = vmax.f32 %v307_v46, 0.0  ;;  %v310_v51 = vpop.f32.mrb[20].mxu0 }
 0x100   :  { %v510_v52 = vpack.c.bf16 %v363_v48, %v361_v47  ;;  %v312_v53 = vpop.f32.mrb[21].mxu0  ;;  %v311_v56 = vadd.f32 %v310_v51, %v108_v54 }
 0x101   :  { %v508_v55 = vpack.c.bf16 %v364_v50, %v362_v49  ;;  %v313_v58 = vadd.f32 %v312_v53, %v108_v54 }
 0x102   :  { %v365_v63 = vmax.f32 %v311_v56, 0.0 }
 0x103   :  { %v316_v59 = vpop.f32.mrb[22].mxu0  ;;  %509 = vmatprep.subr.bf16.mxu1 %v508_v55  ;;  %v366_v1 = vmax.f32 %v313_v58, 0.0 }
 0x104   :  { %v317_v60 = vadd.f32 %v316_v59, %v113_v57  ;;  %v318_v61 = vpop.f32.mrb[23].mxu0  ;;  %511 = vmatpush1.bf16.msra.mxu1 %v510_v52 }
 0x105   :  { %v319_v62 = vadd.f32 %v318_v61, %v113_v57 }
 0x106   :  { %v367_v0 = vmax.f32 %v317_v60, 0.0 }
 0x107   :  { %v368_v2 = vmax.f32 %v319_v62, 0.0  ;;  %v322_v3 = vpop.f32.mrb[24].mxu0 }
 0x108   :  { %v514_v4 = vpack.c.bf16 %v367_v0, %v365_v63  ;;  %v324_v5 = vpop.f32.mrb[25].mxu0  ;;  %v323_v8 = vadd.f32 %v322_v3, %v118_v6 }
 0x109   :  { %v512_v7 = vpack.c.bf16 %v368_v2, %v366_v1  ;;  %v325_v10 = vadd.f32 %v324_v5, %v118_v6 }
 0x10a   :  { %v369_v15 = vmax.f32 %v323_v8, 0.0 }
 0x10b   :  { %v328_v11 = vpop.f32.mrb[26].mxu0  ;;  %513 = vmatprep.subr.bf16.mxu1 %v512_v7  ;;  %v370_v17 = vmax.f32 %v325_v10, 0.0 }
 0x10c   :  { %v329_v12 = vadd.f32 %v328_v11, %v123_v9  ;;  %v330_v13 = vpop.f32.mrb[27].mxu0  ;;  %515 = vmatpush1.bf16.msra.mxu1 %v514_v4 }
 0x10d   :  { %v331_v14 = vadd.f32 %v330_v13, %v123_v9 }
 0x10e   :  { %v371_v16 = vmax.f32 %v329_v12, 0.0 }
 0x10f   :  { %v372_v18 = vmax.f32 %v331_v14, 0.0  ;;  %v334_v19 = vpop.f32.mrb[28].mxu0 }
 0x110   :  { %v518_v20 = vpack.c.bf16 %v371_v16, %v369_v15  ;;  %v336_v21 = vpop.f32.mrb[29].mxu0  ;;  %v335_v24 = vadd.f32 %v334_v19, %v128_v22 }
 0x111   :  { %v516_v23 = vpack.c.bf16 %v372_v18, %v370_v17  ;;  %v337_v26 = vadd.f32 %v336_v21, %v128_v22 }
 0x112   :  { %v373_v31 = vmax.f32 %v335_v24, 0.0 }
 0x113   :  { %v340_v27 = vpop.f32.mrb[30].mxu0  ;;  %517 = vmatprep.subr.bf16.mxu1 %v516_v23  ;;  %v374_v33 = vmax.f32 %v337_v26, 0.0 }
 0x114   :  { %v341_v28 = vadd.f32 %v340_v27, %v133_v25  ;;  %v342_v29 = vpop.f32.mrb[31].mxu0  ;;  %519 = vmatpush1.bf16.msra.mxu1 %v518_v20 }
 0x115   :  { %v343_v30 = vadd.f32 %v342_v29, %v133_v25 }
 0x116   :  { %v375_v32 = vmax.f32 %v341_v28, 0.0 }
 0x117   :  { %v376_v34 = vmax.f32 %v343_v30, 0.0 }
 0x118   :  { %v522_v35 = vpack.c.bf16 %v375_v32, %v373_v31 }
 0x119   :  { %v520_v36 = vpack.c.bf16 %v376_v34, %v374_v33 }
 0x11b   :  { %521 = vmatprep.subr.bf16.mxu1 %v520_v36 }
 0x11c   :  { %523 = vmatpush1.bf16.msra.mxu1 %v522_v35 }
 0x11f   :  { %449 = vmatmul.mubr.f32.vlgmr.msra.gmra.mrb[0].mxu1 %v377_v37 }
 0x1f2   :  { %v450_v39 = vpop.f32.mrb[0].mxu1 }
 0x1f3   :  { %v451_v40 = vadd.f32 %v450_v39, %v382_v38  ;;  %v452_v41 = vpop.f32.mrb[1].mxu1 }
 0x1f4   :  { %v453_v42 = vadd.f32 %v452_v41, %v382_v38 }
 0x1f5   :  { %529 = vtanh.f32 %v451_v40 }
 0x1f6   :  { %531 = vtanh.f32 %v453_v42 }
 0x1ff   :  { %v530_v43 = vpop.eup %529 }
 0x200   :  { %v532_v44 = vpop.eup %531 }
 0x201   :  { %v459_v45 = vcombine.low %v530_v43, %v532_v44 }
 0x203   :  { %461 = vst [vmem:[#allocation2] sm:$0xff] %v459_v45 }
 0x204   :  { %544 = shalt.err (!%p541_p4)
}
 0x205   :  { %s545_s13 = scalar_lea.hbm %s748_s5, 128 }
 0x206   :  { %p546_p5 = scmp.ne.s32.totalorder %s748_s5, %s545_s13  ;;  %p549_p6 = scmp.lt.u32.totalorder %s545_s13, %s748_s5 }
 0x208   :  { %p551_p7 = pnand %p549_p6, %p546_p5 }
 0x20a   :  { %554 = shalt.err (!%p551_p7)
}
 0x20b   :  { %471 = dma.vmem_to_hbm [thread:$0]  %s469_s10, 128, %s748_s5, [#allocation3]  }
 0x20c   :  { %555 = dma.done.wait [#allocation3], 128  }
 0x20d   :  { %556 = vsyncadd [#allocation3], 4294967168 }
 0x20e   :  { %475 = vsyncpa [#allocation3], 1 }

</bundles_post_ra>
